<compile_context>
chip_gen: v7x
topology: tpu7x:2x2x1
jax: 0.10.0
libtpu: 0.0.40
codegen_flags: <defaults>
</compile_context>

<pallas_src>
import functools

import jax
import jax.numpy as jnp
from jax.experimental import pallas as pl
from jax.experimental.pallas import tpu as pltpu


def _round_up(x, m):
    return ((x + m - 1) // m) * m


def _tpu_vmem_capacity_bytes():
    """Per-core VMEM capacity; conservative fallback if the query fails."""
    try:
        return int(pltpu.get_tpu_info().vmem_capacity_bytes)
    except Exception:
        return 64 * 1024 * 1024  # v7x per-TensorCore size (smallest current gen)


def _fast_rcnn_fused_kernel(x_ref, w_ref, b_ref, out_ref, *, num_classes, cls_pad):
    """Fused cls+bbox head: one bf16 MXU matmul, softmax on the cls lane group."""
    x = x_ref[...]
    if x.dtype != w_ref.dtype:
        x = x.astype(w_ref.dtype)                                  # bf16 operands
    logits = jnp.dot(x, w_ref[...],
                     preferred_element_type=jnp.float32) + b_ref[...]   # (T, P) f32

    # Softmax only over the first (128-aligned) class lane group.
    cls_logits = logits[:, :cls_pad]                               # static, lane-aligned
    col = jax.lax.broadcasted_iota(jnp.int32, (1, cls_pad), 1)
    is_cls = col < num_classes                                     # (1, cls_pad) mask
    masked = jnp.where(is_cls, cls_logits, -jnp.inf)
    m = jnp.max(masked, axis=-1, keepdims=True)
    e = jnp.where(is_cls, jnp.exp(masked - m), 0.0)
    denom = jnp.sum(e, axis=-1, keepdims=True)
    sm = e / denom                                                 # exact divide

    out_ref[:, :cls_pad] = sm.astype(out_ref.dtype)
    out_ref[:, cls_pad:] = logits[:, cls_pad:].astype(out_ref.dtype)   # bbox pass-through


def prepare_fast_rcnn_params(cls_w, cls_b, bbox_w, bbox_b,
                             *, weight_dtype=jnp.bfloat16):
    """One-time (model-load) prep: fuse, transpose, lane-pad, cast to bf16.

    Column layout of the fused head: [cls | pad to 128 | bbox | pad to 256k].
    """
    num_classes, dim_in = cls_w.shape
    bbox_out = bbox_w.shape[0]                                     # 4 * num_classes
    cls_pad = _round_up(num_classes, 128)                          # class lane group(s)
    padded_out = _round_up(cls_pad + bbox_out, 256)                # 256-wide MXU native

    w_all = jnp.zeros((dim_in, padded_out), dtype=jnp.float32)
    w_all = w_all.at[:, :num_classes].set(cls_w.T)
    w_all = w_all.at[:, cls_pad:cls_pad + bbox_out].set(bbox_w.T)
    w_all = w_all.astype(weight_dtype)

    b_all = jnp.zeros((1, padded_out), dtype=jnp.float32)          # bias kept f32
    b_all = b_all.at[0, :num_classes].set(cls_b)
    b_all = b_all.at[0, cls_pad:cls_pad + bbox_out].set(bbox_b)

    return dict(w_all=w_all, b_all=b_all, num_classes=num_classes,
                cls_pad=cls_pad, bbox_out=bbox_out, dim_in=dim_in,
                padded_out=padded_out)


def _footprint_terms(d, p, x_itemsize, w_itemsize, out_itemsize):
    # Resident fused weights + bias; count the default double-buffering.
    resident = 2 * (d * p * w_itemsize + p * 4)
    # Per-row: double-buffered x / out tiles + ~6 (T,P)-f32 in-kernel temps.
    per_row = 2 * d * x_itemsize + 2 * p * out_itemsize + 6 * p * 4
    return resident, per_row


def _choose_tile_n(n, d, p, x_itemsize, w_itemsize, out_itemsize):
    """Largest 16-aligned row tile fitting the generation-aware VMEM budget."""
    capacity = _tpu_vmem_capacity_bytes()
    budget = int(capacity * 0.78)                 # ~50 MiB on v7x, ~100 MiB on v5e/v6e
    resident, per_row = _footprint_terms(d, p, x_itemsize, w_itemsize, out_itemsize)
    avail = max(budget - resident, 16 * per_row)
    tile = (avail // per_row) // 16 * 16          # bf16 packs 2 rows/sublane -> 16-align
    tile = max(16, min(int(tile), 1024))
    if n >= 32:
        # Keep >= 2 grid steps so both v7x TensorCores get work.
        tile = min(tile, max(16, _round_up(pl.cdiv(n, 2), 16)))
    if tile >= n:
        return int(n)                             # single block == full row extent
    return int(tile)


def _vmem_limit_bytes(tile_n, d, p, x_itemsize, w_itemsize, out_itemsize):
    capacity = _tpu_vmem_capacity_bytes()
    resident, per_row = _footprint_terms(d, p, x_itemsize, w_itemsize, out_itemsize)
    est = resident + tile_n * per_row + (4 << 20)          # + Mosaic internals headroom
    cap = min(capacity - (8 << 20), 100 << 20)             # ~56 MiB v7x, 100 MiB v5e/v6e
    return int(min(max(est, 32 << 20), cap))


def fast_rcnn_outputs_forward(x, params):
    """x: (N, C, H, W) or (N, D); params from prepare_fast_rcnn_params."""
    if x.ndim == 4:
        x = x.reshape(x.shape[0], -1)                      # same as torch .view(N, -1)
    n, d = x.shape
    nc = params["num_classes"]
    cls_pad = params["cls_pad"]
    bbox_out = params["bbox_out"]
    p = params["padded_out"]
    w_all, b_all = params["w_all"], params["b_all"]

    x_item = x.dtype.itemsize
    w_item = w_all.dtype.itemsize
    out_item = x.dtype.itemsize
    tile_n = _choose_tile_n(n, d, p, x_item, w_item, out_item)
    grid_n = pl.cdiv(n, tile_n)                            # ragged last block, no jnp.pad
    vmem_limit = _vmem_limit_bytes(tile_n, d, p, x_item, w_item, out_item)

    fused = pl.pallas_call(
        functools.partial(_fast_rcnn_fused_kernel, num_classes=nc, cls_pad=cls_pad),
        out_shape=jax.ShapeDtypeStruct((n, p), x.dtype),
        grid_spec=pltpu.PrefetchScalarGridSpec(
            num_scalar_prefetch=0,
            grid=(grid_n,),
            in_specs=[
                pl.BlockSpec((tile_n, d), lambda i: (i, 0)),   # streamed x row tile
                pl.BlockSpec((d, p), lambda i: (0, 0)),        # resident fused weights
                pl.BlockSpec((1, p), lambda i: (0, 0)),        # resident fused bias
            ],
            out_specs=pl.BlockSpec((tile_n, p), lambda i: (i, 0)),
        ),
        compiler_params=pltpu.CompilerParams(
            dimension_semantics=("parallel",),                 # megacore-shardable
            vmem_limit_bytes=vmem_limit,
        ),
    )(x, w_all, b_all)

    cls_score = fused[:, :nc]
    bbox_pred = fused[:, cls_pad:cls_pad + bbox_out]
    return cls_score, bbox_pred


def _reference(x, cls_w, cls_b, bbox_w, bbox_b):
    if x.ndim == 4:
        x = x.reshape(x.shape[0], -1)
    cls = jax.nn.softmax(x @ cls_w.T + cls_b, axis=1)
    bbox = x @ bbox_w.T + bbox_b
    return cls, bbox


if __name__ == "__main__":
    key = jax.random.PRNGKey(0)
    k_x, k_wc, k_wb = jax.random.split(key, 3)

    # Small shapes consistent with the module: NCHW roi features.
    N, C, H, W = 2, 4, 16, 16
    dim_in = C * H * W                 # 1024
    dim_out = 8                        # num classes

    x = jax.random.normal(k_x, (N, C, H, W), dtype=jnp.float32)

    # Deterministic init matching _init_weights(): normal std, zero bias.
    cls_w = 0.01 * jax.random.normal(k_wc, (dim_out, dim_in), dtype=jnp.float32)
    cls_b = jnp.zeros((dim_out,), dtype=jnp.float32)
    bbox_w = 0.001 * jax.random.normal(k_wb, (dim_out * 4, dim_in), dtype=jnp.float32)
    bbox_b = jnp.zeros((dim_out * 4,), dtype=jnp.float32)

    # One-time weight prep (fuse / transpose / pad / bf16 cast).
    params = prepare_fast_rcnn_params(cls_w, cls_b, bbox_w, bbox_b)

    cls_score, bbox_pred = fast_rcnn_outputs_forward(x, params)
    jax.block_until_ready((cls_score, bbox_pred))

    cls_ref, bbox_ref = _reference(x, cls_w, cls_b, bbox_w, bbox_b)
    assert cls_score.shape == (N, dim_out)
    assert bbox_pred.shape == (N, dim_out * 4)
    # Tolerances account for bf16 matmul operands (f32 accumulate) vs f32 reference.
    assert jnp.allclose(cls_score, cls_ref, atol=5e-3, rtol=5e-2)
    assert jnp.allclose(bbox_pred, bbox_ref, atol=5e-3, rtol=5e-2)
    # Exact softmax divide: class probabilities sum to 1.
    assert jnp.allclose(jnp.sum(cls_score, axis=1), 1.0, atol=1e-5)

    # TODO(synk): training-mode branch (softmax skipped) is not exposed; this
    # kernel implements the eval-mode forward only.
    print("KERNEL_OK")
</pallas_src>

<mosaic_0001>
module attributes {stable_mosaic.version = 11 : i64} {
  func.func @_fast_rcnn_fused_kernel(%arg0: i32, %arg1: memref<2x1024xf32, #tpu.memory_space<vmem>>, %arg2: memref<1024x256xbf16, #tpu.memory_space<vmem>>, %arg3: memref<1x256xf32, #tpu.memory_space<vmem>>, %arg4: memref<2x256xf32, #tpu.memory_space<vmem>>) attributes {dimension_semantics = [#tpu.dimension_semantics<parallel>], iteration_bounds = array<i64: 1>, scalar_prefetch = 0 : i64, scratch_operands = 0 : i64, tpu.core_type = #tpu.core_type<tc>, window_params = [{transform_indices = @transform_0, window_bounds = array<i64: 2, 1024>}, {pipeline_mode = #tpu.pipeline_mode<synchronous>, transform_indices = @transform_1, window_bounds = array<i64: 1024, 256>}, {pipeline_mode = #tpu.pipeline_mode<synchronous>, transform_indices = @transform_2, window_bounds = array<i64: 1, 256>}, {transform_indices = @transform_3, window_bounds = array<i64: 2, 256>}]} {
    %c0 = arith.constant 0 : index
    %c0_0 = arith.constant 0 : index
    %0 = vector.load %arg1[%c0, %c0_0] : memref<2x1024xf32, #tpu.memory_space<vmem>>, vector<2x1024xf32>
    %1 = arith.truncf %0 : vector<2x1024xf32> to vector<2x1024xbf16>
    %c0_1 = arith.constant 0 : index
    %c0_2 = arith.constant 0 : index
    %2 = vector.load %arg2[%c0_1, %c0_2] : memref<1024x256xbf16, #tpu.memory_space<vmem>>, vector<1024x256xbf16>
    %cst = arith.constant dense<0.000000e+00> : vector<2x256xf32>
    %3 = tpu.matmul %1, %2, %cst {dimension_numbers = #tpu.dot_dimension_numbers<[1], [0], [0], [1], [0, 0, 1, 1], [], []>} : vector<2x1024xbf16>, vector<1024x256xbf16>, vector<2x256xf32> -> vector<2x256xf32>
    %c0_3 = arith.constant 0 : index
    %c0_4 = arith.constant 0 : index
    %4 = vector.load %arg3[%c0_3, %c0_4] : memref<1x256xf32, #tpu.memory_space<vmem>>, vector<1x256xf32>
    %5 = vector.broadcast %4 : vector<1x256xf32> to vector<2x256xf32>
    %6 = arith.addf %3, %5 : vector<2x256xf32>
    %7 = vector.extract_strided_slice %6 {offsets = [0, 0], sizes = [2, 128], strides = [1, 1]} : vector<2x256xf32> to vector<2x128xf32>
    %8 = tpu.iota {dimensions = array<i32: 1>} : vector<1x128xi32>
    %c8_i32 = arith.constant 8 : i32
    %9 = vector.broadcast %c8_i32 : i32 to vector<1x128xi32>
    %10 = arith.cmpi slt, %8, %9 : vector<1x128xi32>
    %cst_5 = arith.constant 0xFF800000 : f32
    %11 = vector.shape_cast %10 : vector<1x128xi1> to vector<1x128xi1>
    %12 = vector.broadcast %11 : vector<1x128xi1> to vector<2x128xi1>
    %13 = vector.broadcast %cst_5 : f32 to vector<2x128xf32>
    %14 = arith.select %12, %7, %13 : vector<2x128xi1>, vector<2x128xf32>
    %cst_6 = arith.constant dense<0xFF800000> : vector<2xf32>
    %15 = vector.multi_reduction <maximumf>, %14, %cst_6 [1] : vector<2x128xf32> to vector<2xf32>
    %16 = vector.shape_cast %15 : vector<2xf32> to vector<2x1xf32>
    %17 = vector.broadcast %16 : vector<2x1xf32> to vector<2x128xf32>
    %18 = arith.subf %14, %17 : vector<2x128xf32>
    %19 = math.exp %18 : vector<2x128xf32>
    %cst_7 = arith.constant 0.000000e+00 : f32
    %20 = vector.shape_cast %10 : vector<1x128xi1> to vector<1x128xi1>
    %21 = vector.broadcast %20 : vector<1x128xi1> to vector<2x128xi1>
    %22 = vector.broadcast %cst_7 : f32 to vector<2x128xf32>
    %23 = arith.select %21, %19, %22 : vector<2x128xi1>, vector<2x128xf32>
    %cst_8 = arith.constant dense<0.000000e+00> : vector<2xf32>
    %24 = vector.multi_reduction <add>, %23, %cst_8 [1] : vector<2x128xf32> to vector<2xf32>
    %25 = vector.shape_cast %24 : vector<2xf32> to vector<2x1xf32>
    %26 = vector.broadcast %25 : vector<2x1xf32> to vector<2x128xf32>
    %27 = arith.divf %23, %26 : vector<2x128xf32>
    %c0_9 = arith.constant 0 : index
    %c0_10 = arith.constant 0 : index
    %28 = vector.load %arg4[%c0_9, %c0_10] : memref<2x256xf32, #tpu.memory_space<vmem>>, vector<2x128xf32>
    tpu.vector_store %arg4[%c0_9, %c0_10], %27 {strides = array<i32>} : memref<2x256xf32, #tpu.memory_space<vmem>>, vector<2x128xf32>,
    %29 = vector.extract_strided_slice %6 {offsets = [0, 128], sizes = [2, 128], strides = [1, 1]} : vector<2x256xf32> to vector<2x128xf32>
    %c0_11 = arith.constant 0 : index
    %c128 = arith.constant 128 : index
    %30 = vector.load %arg4[%c0_11, %c128] : memref<2x256xf32, #tpu.memory_space<vmem>>, vector<2x128xf32>
    tpu.vector_store %arg4[%c0_11, %c128], %29 {strides = array<i32>} : memref<2x256xf32, #tpu.memory_space<vmem>>, vector<2x128xf32>,
    return
  }
  func.func @transform_0(%arg0: i32) -> (i32, i32) {
    %c0_i32 = arith.constant 0 : i32
    %c0_i32_0 = arith.constant 0 : i32
    return %arg0, %c0_i32 : i32, i32
  }
  func.func @transform_1(%arg0: i32) -> (i32, i32) {
    %c0_i32 = arith.constant 0 : i32
    %c0_i32_0 = arith.constant 0 : i32
    %c0_i32_1 = arith.constant 0 : i32
    return %c0_i32, %c0_i32_0 : i32, i32
  }
  func.func @transform_2(%arg0: i32) -> (i32, i32) {
    %c0_i32 = arith.constant 0 : i32
    %c0_i32_0 = arith.constant 0 : i32
    %c0_i32_1 = arith.constant 0 : i32
    return %c0_i32, %c0_i32_0 : i32, i32
  }
  func.func @transform_3(%arg0: i32) -> (i32, i32) {
    %c0_i32 = arith.constant 0 : i32
    %c0_i32_0 = arith.constant 0 : i32
    return %arg0, %c0_i32 : i32, i32
  }
}

</mosaic_0001>

<bundles_post_ra>
// kernel: tpu_custom_call.1
= control target key start
LH: loop header
LB: loop body
LE: loop exit
PB: predicated region body
PF: predicated region fallthrough
CT: control target
= control target key end

     0   :  { %8 = vsyncpa [#allocation3], 0  ;;  %s1589_s0 = inlined_call_operand.hbm [shape: f32[2,1024], index: 0, kind: input, shape index: {}]   ;;  %s1590_s1 = inlined_call_operand.hbm [shape: bf16[1024,256], index: 1, kind: input, shape index: {}]   ;;  %s1591_s2 = inlined_call_operand.vmem [shape: f32[1,256], index: 2, kind: input, shape index: {}]   ;;  %s1592_s3 = inlined_call_operand.hbm [shape: f32[2,256], index: 3, kind: output, shape index: {}]  }
   0x1   :  { %9 = vsyncpa [#allocation6], 0 }
   0x2   :  { %10 = vsyncpa [#allocation4], 0  ;;  %s1492_s12 = smov [#allocation2]   ;;  %s1493_s14 = smov [#allocation5]  }
   0x3   :  { %s17_s13 = sshll.u32 %s1492_s12, 4  ;;  %s26_s15 = sshll.u32 %s1493_s14, 4  ;;  %s18_s13 = int_to_ptr.vmem [resolvable:$true] %s17_s13  ;;  %s1518_s15 = int_to_ptr.vmem [resolvable:$true] %s26_s15 }
   0x4   :  { %s1420_s18 = scalar_lea.hbm %s1589_s0, 256 }
   0x5   :  { %p1421_p0 = scmp.ne.s32.totalorder %s1589_s0, %s1420_s18  ;;  %p1424_p1 = scmp.lt.u32.totalorder %s1420_s18, %s1589_s0 }
   0x7   :  { %p1426_p2 = pnand %p1424_p1, %p1421_p0 }
   0x9   :  { %1429 = shalt.err (!%p1426_p2)
}
   0xa   :  { %s1430_s23 = scalar_lea.vmem %s18_s13, 256  ;;  %p1435_p4 = scmp.lt.s32.totalorder %s18_s13, %s18_s13 }
   0xb   :  { %p1431_p3 = scmp.ne.s32.totalorder %s18_s13, %s1430_s23  ;;  %p1436_p5 = scmp.lt.s32.totalorder %s1430_s23, %s1430_s23 }
   0xd   :  { %p1437_p6 = por %p1436_p5, %p1435_p4 }
   0xf   :  { %p1438_p7 = pnand %p1437_p6, %p1431_p3 }
  0x11   :  { %1441 = shalt.err (!%p1438_p7)
}
  0x12   :  { %20 = dma.hbm_to_vmem [thread:$0]  %s1589_s0, 256, %s18_s13, [#allocation3]  }
  0x13   :  { %s1442_s28 = scalar_lea.hbm %s1590_s1, 16384 }
  0x14   :  { %p1443_p8 = scmp.ne.s32.totalorder %s1590_s1, %s1442_s28  ;;  %p1446_p9 = scmp.lt.u32.totalorder %s1442_s28, %s1590_s1 }
  0x16   :  { %p1448_p10 = pnand %p1446_p9, %p1443_p8 }
  0x18   :  { %1451 = shalt.err (!%p1448_p10)
}
  0x19   :  { %s1452_s6 = scalar_lea.vmem %s1518_s15, 16384  ;;  %p1457_p12 = scmp.lt.s32.totalorder %s1518_s15, %s1518_s15 }
  0x1a   :  { %p1453_p11 = scmp.ne.s32.totalorder %s1518_s15, %s1452_s6  ;;  %p1458_p13 = scmp.lt.s32.totalorder %s1452_s6, %s1452_s6 }
  0x1c   :  { %p1459_p0 = por %p1458_p13, %p1457_p12 }
  0x1e   :  { %p1460_p1 = pnand %p1459_p0, %p1453_p11 }
  0x20   :  { %1463 = shalt.err (!%p1460_p1)
}
  0x21   :  { %s1494_s0 = smov 128   ;;  %s1495_s7 = smov 8  }
  0x22   :  { %32 = dma.hbm_to_vmem [thread:$0]  %s1590_s1, 16384, %s1518_s15, [#allocation6], %s1494_s0, %s1494_s0, %s1495_s7  }
  0x23   :  { %1486 = dma.done.wait [#allocation3], 256  }
  0x24   :  { %1487 = vsyncadd [#allocation3], 4294967040 }
  0x25   :  { %1488 = dma.done.wait [#allocation6], 16384  }
  0x26   :  { %1489 = vsyncadd [#allocation6], 4294950912  ;;  %v1222_v0 = vld [vmem:[#allocation5 + $0x4] ss:$8 sps:$4 sm:$0xff]   ;;  %v1226_v2 = vld [vmem:[#allocation5] ss:$8 sps:$4 sm:$0xff]   ;;  %v49_v38 = vlaneseq }
  0x27   :  { %v1224_v1 = vld [vmem:[#allocation5 + $0x204] ss:$8 sps:$4 sm:$0xff]   ;;  %875 = vmatprep.subr.bf16.mxu1 %v1222_v0  ;;  %v1227_v3 = vld [vmem:[#allocation5 + $0x200] ss:$8 sps:$4 sm:$0xff]   ;;  %v1228_v4 = vld [vmem:[#allocation5 + $0x14] ss:$8 sps:$4 sm:$0xff]  }
  0x28   :  { %957 = vmatprep.subr.bf16.mxu0 %v1224_v1  ;;  %876 = vmatpush1.bf16.msra.mxu1 %v1226_v2  ;;  %v1230_v5 = vld [vmem:[#allocation5 + $0x214] ss:$8 sps:$4 sm:$0xff]   ;;  %v1232_v6 = vld [vmem:[#allocation5 + $0x10] ss:$8 sps:$4 sm:$0xff]   ;;  %v1234_v8 = vld [vmem:[#allocation5 + $0x24] ss:$8 sps:$4 sm:$0xff]  }
  0x29   :  { %958 = vmatpush1.bf16.msra.mxu0 %v1227_v3  ;;  %877 = vmatprep.subr.bf16.mxu1 %v1228_v4  ;;  %v1233_v7 = vld [vmem:[#allocation5 + $0x210] ss:$8 sps:$4 sm:$0xff]   ;;  %v1236_v9 = vld [vmem:[#allocation5 + $0x224] ss:$8 sps:$4 sm:$0xff]   ;;  %v1238_v10 = vld [vmem:[#allocation5 + $0x20] ss:$8 sps:$4 sm:$0xff]  }
  0x2a   :  { %959 = vmatprep.subr.bf16.mxu0 %v1230_v5  ;;  %v1239_v11 = vld [vmem:[#allocation5 + $0x220] ss:$8 sps:$4 sm:$0xff]   ;;  %v1240_v12 = vld [vmem:[#allocation5 + $0x34] ss:$8 sps:$4 sm:$0xff]   ;;  %v1244_v14 = vld [vmem:[#allocation5 + $0x30] ss:$8 sps:$4 sm:$0xff]  }
  0x2b   :  { %v1242_v13 = vld [vmem:[#allocation5 + $0x234] ss:$8 sps:$4 sm:$0xff]   ;;  %v1245_v15 = vld [vmem:[#allocation5 + $0x230] ss:$8 sps:$4 sm:$0xff]   ;;  %v1246_v16 = vld [vmem:[#allocation5 + $0x44] ss:$8 sps:$4 sm:$0xff]  }
  0x2c   :  { %878 = vmatpush1.bf16.msra.mxu1 %v1232_v6  ;;  %v1248_v17 = vld [vmem:[#allocation5 + $0x244] ss:$8 sps:$4 sm:$0xff]   ;;  %v1250_v18 = vld [vmem:[#allocation5 + $0x40] ss:$8 sps:$4 sm:$0xff]   ;;  %v1252_v20 = vld [vmem:[#allocation5 + $0x54] ss:$8 sps:$4 sm:$0xff]  }
  0x2d   :  { %960 = vmatpush1.bf16.msra.mxu0 %v1233_v7  ;;  %879 = vmatprep.subr.bf16.mxu1 %v1234_v8  ;;  %v1251_v19 = vld [vmem:[#allocation5 + $0x240] ss:$8 sps:$4 sm:$0xff]   ;;  %v1254_v21 = vld [vmem:[#allocation5 + $0x254] ss:$8 sps:$4 sm:$0xff]   ;;  %v1256_v22 = vld [vmem:[#allocation5 + $0x50] ss:$8 sps:$4 sm:$0xff]  }
  0x2e   :  { %961 = vmatprep.subr.bf16.mxu0 %v1236_v9  ;;  %v1257_v23 = vld [vmem:[#allocation5 + $0x250] ss:$8 sps:$4 sm:$0xff]   ;;  %v1258_v24 = vld [vmem:[#allocation5 + $0x64] ss:$8 sps:$4 sm:$0xff]   ;;  %v1262_v26 = vld [vmem:[#allocation5 + $0x60] ss:$8 sps:$4 sm:$0xff]  }
  0x2f   :  { %v1260_v25 = vld [vmem:[#allocation5 + $0x264] ss:$8 sps:$4 sm:$0xff]   ;;  %v1263_v27 = vld [vmem:[#allocation5 + $0x260] ss:$8 sps:$4 sm:$0xff]   ;;  %v1264_v28 = vld [vmem:[#allocation5 + $0x74] ss:$8 sps:$4 sm:$0xff]  }
  0x30   :  { %880 = vmatpush1.bf16.msra.mxu1 %v1238_v10  ;;  %v1266_v29 = vld [vmem:[#allocation5 + $0x274] ss:$8 sps:$4 sm:$0xff]   ;;  %v1268_v30 = vld [vmem:[#allocation5 + $0x70] ss:$8 sps:$4 sm:$0xff]   ;;  %v1270_v32 = vld [vmem:[#allocation5 + $0x84] ss:$8 sps:$4 sm:$0xff]  }
  0x31   :  { %962 = vmatpush1.bf16.msra.mxu0 %v1239_v11  ;;  %881 = vmatprep.subr.bf16.mxu1 %v1240_v12  ;;  %v1269_v31 = vld [vmem:[#allocation5 + $0x270] ss:$8 sps:$4 sm:$0xff]   ;;  %v1272_v33 = vld [vmem:[#allocation5 + $0x284] ss:$8 sps:$4 sm:$0xff]   ;;  %v1274_v34 = vld [vmem:[#allocation5 + $0x80] ss:$8 sps:$4 sm:$0xff]  }
  0x32   :  { %963 = vmatprep.subr.bf16.mxu0 %v1242_v13  ;;  %v1275_v35 = vld [vmem:[#allocation5 + $0x280] ss:$8 sps:$4 sm:$0xff]   ;;  %v1496_v36 = vmov 1983009808   ;;  %v1276_v39 = vld [vmem:[#allocation5 + $0x94] ss:$8 sps:$4 sm:$0xff]  }
  0x33   :  { %v47_v37 = vunpack.c.l.s4 %v1496_v36  ;;  %v1278_v40 = vld [vmem:[#allocation5 + $0x294] ss:$8 sps:$4 sm:$0xff]   ;;  %v1280_v41 = vld [vmem:[#allocation5 + $0x90] ss:$8 sps:$4 sm:$0xff]   ;;  %v1550_v43 = vshrl.u32 %v49_v38, 7  ;;  %vm1045_vm1 = vcmask 1041408  }
  0x34   :  { %882 = vmatpush1.bf16.msra.mxu1 %v1244_v14  ;;  %v1281_v44 = vld [vmem:[#allocation5 + $0x290] ss:$8 sps:$4 sm:$0xff]   ;;  %v1282_v45 = vld [vmem:[#allocation5 + $0xa4] ss:$8 sps:$4 sm:$0xff]   ;;  %v1286_v47 = vld [vmem:[#allocation5 + $0xa0] ss:$8 sps:$4 sm:$0xff]  }
  0x35   :  { %964 = vmatpush1.bf16.msra.mxu0 %v1245_v15  ;;  %883 = vmatprep.subr.bf16.mxu1 %v1246_v16  ;;  %v48_v42 = vunpack.c.0.s8 %v47_v37  ;;  %v1284_v46 = vld [vmem:[#allocation5 + $0x2a4] ss:$8 sps:$4 sm:$0xff]   ;;  %v1287_v48 = vld [vmem:[#allocation5 + $0x2a0] ss:$8 sps:$4 sm:$0xff]   ;;  %v1288_v50 = vld [vmem:[#allocation5 + $0xb4] ss:$8 sps:$4 sm:$0xff]  }
  0x36   :  { %965 = vmatprep.subr.bf16.mxu0 %v1248_v17  ;;  %v1290_v51 = vld [vmem:[#allocation5 + $0x2b4] ss:$8 sps:$4 sm:$0xff]   ;;  %v1292_v53 = vld [vmem:[#allocation5 + $0xb0] ss:$8 sps:$4 sm:$0xff]   ;;  %v1294_v57 = vld [vmem:[#allocation5 + $0xc4] ss:$8 sps:$4 sm:$0xff]  }
  0x37   :  { %v51_v49 = vsub.s32 %v48_v42, %v1550_v43  ;;  %v41_v52 = vld [vmem:[#allocation2] sm:$0xff]  ;;  %v42_v56 = vld [vmem:[#allocation2 + $0x8] sm:$0xff]  ;;  %v1296_v58 = vld [vmem:[#allocation5 + $0x2c4] ss:$8 sps:$4 sm:$0xff]  }
  0x38   :  { %884 = vmatpush1.bf16.msra.mxu1 %v1250_v18  ;;  %v1293_v55 = vld [vmem:[#allocation5 + $0x2b0] ss:$8 sps:$4 sm:$0xff]   ;;  %v1298_v63 = vld [vmem:[#allocation5 + $0xc0] ss:$8 sps:$4 sm:$0xff]   ;;  %v1300_v1 = vld [vmem:[#allocation5 + $0xd4] ss:$8 sps:$4 sm:$0xff]   ;;  %v45_v8 = vcombine.high %v41_v52, %v41_v52  ;;  %v62_v9 = vcombine.high %v42_v56, %v42_v56 }
  0x39   :  { %966 = vmatpush1.bf16.msra.mxu0 %v1251_v19  ;;  %885 = vmatprep.subr.bf16.mxu1 %v1252_v20  ;;  %v1553_v54 = vrot.slane %v41_v52, %v51_v49  ;;  %v69_v60 = vrot.slane %v42_v56, %v51_v49  ;;  %v1299_v0 = vld [vmem:[#allocation5 + $0x2c0] ss:$8 sps:$4 sm:$0xff]   ;;  %v1302_v2 = vld [vmem:[#allocation5 + $0x2d4] ss:$8 sps:$4 sm:$0xff]   ;;  %v1304_v4 = vld [vmem:[#allocation5 + $0xd0] ss:$8 sps:$4 sm:$0xff]  }
  0x3a   :  { %967 = vmatprep.subr.bf16.mxu0 %v1254_v21  ;;  %v1305_v5 = vld [vmem:[#allocation5 + $0x2d0] ss:$8 sps:$4 sm:$0xff]   ;;  %v1306_v6 = vld [vmem:[#allocation5 + $0xe4] ss:$8 sps:$4 sm:$0xff]   ;;  %v1310_v10 = vld [vmem:[#allocation5 + $0xe0] ss:$8 sps:$4 sm:$0xff]   ;;  %v1557_v14 = vrot.slane %v45_v8, %v51_v49  ;;  %v1559_v15 = vrot.slane %v62_v9, %v51_v49 }
  0x3b   :  { %v60_v59 = vcombine.high %v1553_v54, %v1553_v54  ;;  %v77_v62 = vcombine.high %v69_v60, %v69_v60  ;;  %v1308_v7 = vld [vmem:[#allocation5 + $0x2e4] ss:$8 sps:$4 sm:$0xff]   ;;  %v1311_v11 = vld [vmem:[#allocation5 + $0x2e0] ss:$8 sps:$4 sm:$0xff]   ;;  %v1312_v12 = vld [vmem:[#allocation5 + $0xf4] ss:$8 sps:$4 sm:$0xff]  }
  0x3c   :  { %886 = vmatpush1.bf16.msra.mxu1 %v1256_v22  ;;  %v1314_v13 = vld [vmem:[#allocation5 + $0x2f4] ss:$8 sps:$4 sm:$0xff]   ;;  %v1316_v16 = vld [vmem:[#allocation5 + $0xf0] ss:$8 sps:$4 sm:$0xff]   ;;  %v1321_v18 = vld [vmem:[#allocation5 + $0x104] ss:$8 sps:$4 sm:$0xff]   ;;  %v61_v20 = vcombine.high %v1557_v14, %v1557_v14  ;;  %v78_v21 = vcombine.high %v1559_v15, %v1559_v15  ;;  %v87_v22 = vpack.c.bf16 %v1553_v54, %v1553_v54 }
  0x3d   :  { %968 = vmatpush1.bf16.msra.mxu0 %v1257_v23  ;;  %887 = vmatprep.subr.bf16.mxu1 %v1258_v24  ;;  %v88_v61 = vpack.c.bf16 %v60_v59, %v60_v59  ;;  %v92_v3 = vpack.c.bf16 %v77_v62, %v77_v62  ;;  %v1317_v17 = vld [vmem:[#allocation5 + $0x2f0] ss:$8 sps:$4 sm:$0xff]   ;;  %v1325_v19 = vld [vmem:[#allocation5 + $0x304] ss:$8 sps:$4 sm:$0xff]   ;;  %v91_v23 = vpack.c.bf16 %v69_v60, %v69_v60  ;;  %v1319_v24 = vld [vmem:[#allocation5 + $0x100] ss:$8 sps:$4 sm:$0xff]  }
  0x3e   :  { %969 = vmatprep.subr.bf16.mxu0 %v1260_v25  ;;  %v1323_v25 = vld [vmem:[#allocation5 + $0x300] ss:$8 sps:$4 sm:$0xff]   ;;  %v1340_v36 = vld [vmem:[#allocation5 + $0x134] ss:$8 sps:$4 sm:$0xff]   ;;  %v1349_v42 = vld [vmem:[#allocation5 + $0x344] ss:$8 sps:$4 sm:$0xff]  }
  0x3f   :  { %907 = vmatprep.mubr.bf16.mxu1 %v88_v61  ;;  %989 = vmatprep.mubr.bf16.mxu0 %v92_v3  ;;  %v1343_v37 = vld [vmem:[#allocation5 + $0x334] ss:$8 sps:$4 sm:$0xff]   ;;  %v1353_v49 = vld [vmem:[#allocation5 + $0x350] ss:$8 sps:$4 sm:$0xff]   ;;  %v1356_v52 = vld [vmem:[#allocation5 + $0x160] ss:$8 sps:$4 sm:$0xff]  }
  0x40   :  { %888 = vmatpush1.bf16.msra.mxu1 %v1262_v26  ;;  %v1328_v26 = vld [vmem:[#allocation5 + $0x114] ss:$8 sps:$4 sm:$0xff]   ;;  %v1362_v56 = vld [vmem:[#allocation5 + $0x170] ss:$8 sps:$4 sm:$0xff]   ;;  %v1373_v59 = vld [vmem:[#allocation5 + $0x384] ss:$8 sps:$4 sm:$0xff]  }
  0x41   :  { %970 = vmatpush1.bf16.msra.mxu0 %v1263_v27  ;;  %889 = vmatprep.subr.bf16.mxu1 %v1264_v28  ;;  %v1331_v27 = vld [vmem:[#allocation5 + $0x314] ss:$8 sps:$4 sm:$0xff]   ;;  %v90_v28 = vpack.c.bf16 %v61_v20, %v61_v20  ;;  %v1368_v60 = vld [vmem:[#allocation5 + $0x180] ss:$8 sps:$4 sm:$0xff]   ;;  %v1385_v3 = vld [vmem:[#allocation5 + $0x3a4] ss:$8 sps:$4 sm:$0xff]  }
  0x42   :  { %971 = vmatprep.subr.bf16.mxu0 %v1266_v29  ;;  %v94_v29 = vpack.c.bf16 %v78_v21, %v78_v21  ;;  %v1364_v54 = vld [vmem:[#allocation5 + $0x174] ss:$8 sps:$4 sm:$0xff]   ;;  %v1371_v61 = vld [vmem:[#allocation5 + $0x380] ss:$8 sps:$4 sm:$0xff]   ;;  %v1386_v8 = vld [vmem:[#allocation5 + $0x1b0] ss:$8 sps:$4 sm:$0xff]  }
  0x43   :  { %v1376_v62 = vld [vmem:[#allocation5 + $0x194] ss:$8 sps:$4 sm:$0xff]   ;;  %v1389_v9 = vld [vmem:[#allocation5 + $0x3b0] ss:$8 sps:$4 sm:$0xff]   ;;  %v1406_v20 = vld [vmem:[#allocation5 + $0x1e4] ss:$8 sps:$4 sm:$0xff]  }
  0x44   :  { %890 = vmatpush1.bf16.msra.mxu1 %v1268_v30  ;;  %v1326_v30 = vld [vmem:[#allocation5 + $0x110] ss:$8 sps:$4 sm:$0xff]   ;;  %v1409_v21 = vld [vmem:[#allocation5 + $0x3e4] ss:$8 sps:$4 sm:$0xff]  }
  0x45   :  { %972 = vmatpush1.bf16.msra.mxu0 %v1269_v31  ;;  %891 = vmatprep.subr.bf16.mxu1 %v1270_v32  ;;  %v1329_v31 = vld [vmem:[#allocation5 + $0x310] ss:$8 sps:$4 sm:$0xff]   ;;  %v1334_v32 = vld [vmem:[#allocation5 + $0x124] ss:$8 sps:$4 sm:$0xff]  }
  0x46   :  { %973 = vmatprep.subr.bf16.mxu0 %v1272_v33  ;;  %v1337_v33 = vld [vmem:[#allocation5 + $0x324] ss:$8 sps:$4 sm:$0xff]  }
  0x48   :  { %892 = vmatpush1.bf16.msra.mxu1 %v1274_v34  ;;  %v1332_v34 = vld [vmem:[#allocation5 + $0x120] ss:$8 sps:$4 sm:$0xff]  }
  0x49   :  { %974 = vmatpush1.bf16.msra.mxu0 %v1275_v35  ;;  %893 = vmatprep.subr.bf16.mxu1 %v1276_v39  ;;  %v1335_v35 = vld [vmem:[#allocation5 + $0x320] ss:$8 sps:$4 sm:$0xff]   ;;  %v1338_v39 = vld [vmem:[#allocation5 + $0x130] ss:$8 sps:$4 sm:$0xff]  }
  0x4a   :  { %975 = vmatprep.subr.bf16.mxu0 %v1278_v40  ;;  %v1341_v40 = vld [vmem:[#allocation5 + $0x330] ss:$8 sps:$4 sm:$0xff]  }
  0x4c   :  { %894 = vmatpush1.bf16.msra.mxu1 %v1280_v41  ;;  %v1346_v41 = vld [vmem:[#allocation5 + $0x144] ss:$8 sps:$4 sm:$0xff]  }
  0x4d   :  { %976 = vmatpush1.bf16.msra.mxu0 %v1281_v44  ;;  %895 = vmatprep.subr.bf16.mxu1 %v1282_v45  ;;  %v1344_v44 = vld [vmem:[#allocation5 + $0x140] ss:$8 sps:$4 sm:$0xff]  }
  0x4e   :  { %977 = vmatprep.subr.bf16.mxu0 %v1284_v46  ;;  %v1347_v45 = vld [vmem:[#allocation5 + $0x340] ss:$8 sps:$4 sm:$0xff]   ;;  %v1352_v46 = vld [vmem:[#allocation5 + $0x154] ss:$8 sps:$4 sm:$0xff]  }
  0x50   :  { %896 = vmatpush1.bf16.msra.mxu1 %v1286_v47  ;;  %v1355_v47 = vld [vmem:[#allocation5 + $0x354] ss:$8 sps:$4 sm:$0xff]  }
  0x51   :  { %978 = vmatpush1.bf16.msra.mxu0 %v1287_v48  ;;  %897 = vmatprep.subr.bf16.mxu1 %v1288_v50  ;;  %v1350_v48 = vld [vmem:[#allocation5 + $0x150] ss:$8 sps:$4 sm:$0xff]   ;;  %v1358_v50 = vld [vmem:[#allocation5 + $0x164] ss:$8 sps:$4 sm:$0xff]  }
  0x52   :  { %979 = vmatprep.subr.bf16.mxu0 %v1290_v51  ;;  %v1361_v51 = vld [vmem:[#allocation5 + $0x364] ss:$8 sps:$4 sm:$0xff]  }
  0x54   :  { %898 = vmatpush1.bf16.msra.mxu1 %v1292_v53  ;;  %v1359_v53 = vld [vmem:[#allocation5 + $0x360] ss:$8 sps:$4 sm:$0xff]  }
  0x55   :  { %980 = vmatpush1.bf16.msra.mxu0 %v1293_v55  ;;  %899 = vmatprep.subr.bf16.mxu1 %v1294_v57  ;;  %v1367_v55 = vld [vmem:[#allocation5 + $0x374] ss:$8 sps:$4 sm:$0xff]   ;;  %v1365_v57 = vld [vmem:[#allocation5 + $0x370] ss:$8 sps:$4 sm:$0xff]  }
  0x56   :  { %981 = vmatprep.subr.bf16.mxu0 %v1296_v58  ;;  %v1370_v58 = vld [vmem:[#allocation5 + $0x184] ss:$8 sps:$4 sm:$0xff]  }
  0x58   :  { %900 = vmatpush1.bf16.msra.mxu1 %v1298_v63  ;;  %v1379_v63 = vld [vmem:[#allocation5 + $0x394] ss:$8 sps:$4 sm:$0xff]  }
  0x59   :  { %982 = vmatpush1.bf16.msra.mxu0 %v1299_v0  ;;  %901 = vmatprep.subr.bf16.mxu1 %v1300_v1  ;;  %v1374_v0 = vld [vmem:[#allocation5 + $0x190] ss:$8 sps:$4 sm:$0xff]  }
  0x5a   :  { %983 = vmatprep.subr.bf16.mxu0 %v1302_v2  ;;  %v1377_v1 = vld [vmem:[#allocation5 + $0x390] ss:$8 sps:$4 sm:$0xff]   ;;  %v1382_v2 = vld [vmem:[#allocation5 + $0x1a4] ss:$8 sps:$4 sm:$0xff]  }
  0x5c   :  { %902 = vmatpush1.bf16.msra.mxu1 %v1304_v4  ;;  %v1380_v4 = vld [vmem:[#allocation5 + $0x1a0] ss:$8 sps:$4 sm:$0xff]  }
  0x5d   :  { %984 = vmatpush1.bf16.msra.mxu0 %v1305_v5  ;;  %903 = vmatprep.subr.bf16.mxu1 %v1306_v6  ;;  %v1383_v5 = vld [vmem:[#allocation5 + $0x3a0] ss:$8 sps:$4 sm:$0xff]   ;;  %v1388_v6 = vld [vmem:[#allocation5 + $0x1b4] ss:$8 sps:$4 sm:$0xff]  }
  0x5e   :  { %985 = vmatprep.subr.bf16.mxu0 %v1308_v7  ;;  %v1391_v7 = vld [vmem:[#allocation5 + $0x3b4] ss:$8 sps:$4 sm:$0xff]  }
  0x60   :  { %904 = vmatpush1.bf16.msra.mxu1 %v1310_v10  ;;  %v1394_v10 = vld [vmem:[#allocation5 + $0x1c4] ss:$8 sps:$4 sm:$0xff]  }
  0x61   :  { %986 = vmatpush1.bf16.msra.mxu0 %v1311_v11  ;;  %905 = vmatprep.subr.bf16.mxu1 %v1312_v12  ;;  %v1397_v11 = vld [vmem:[#allocation5 + $0x3c4] ss:$8 sps:$4 sm:$0xff]   ;;  %v1392_v12 = vld [vmem:[#allocation5 + $0x1c0] ss:$8 sps:$4 sm:$0xff]  }
  0x62   :  { %987 = vmatprep.subr.bf16.mxu0 %v1314_v13  ;;  %v1395_v13 = vld [vmem:[#allocation5 + $0x3c0] ss:$8 sps:$4 sm:$0xff]  }
  0x64   :  { %906 = vmatpush1.bf16.msra.mxu1 %v1316_v16  ;;  %v1400_v16 = vld [vmem:[#allocation5 + $0x1d4] ss:$8 sps:$4 sm:$0xff]  }
  0x65   :  { %988 = vmatpush1.bf16.msra.mxu0 %v1317_v17  ;;  %916 = vmatprep.subr.bf16.mxu1 %v1321_v18  ;;  %v1403_v17 = vld [vmem:[#allocation5 + $0x3d4] ss:$8 sps:$4 sm:$0xff]   ;;  %v1398_v18 = vld [vmem:[#allocation5 + $0x1d0] ss:$8 sps:$4 sm:$0xff]  }
  0x66   :  { %998 = vmatprep.subr.bf16.mxu0 %v1325_v19  ;;  %v1401_v19 = vld [vmem:[#allocation5 + $0x3d0] ss:$8 sps:$4 sm:$0xff]  }
  0x67   :  { %908 = vmatmul.mubr.bf16.vlgmr.msra.gmra.mrb[0].mxu1 %v87_v22  ;;  %v1404_v22 = vld [vmem:[#allocation5 + $0x1e0] ss:$8 sps:$4 sm:$0xff]  }
  0x68   :  { %990 = vmatmul.mubr.bf16.vlgmr.msra.gmra.mrb[0].mxu0 %v91_v23  ;;  %917 = vmatpush1.bf16.msra.mxu1 %v1319_v24  ;;  %v1407_v23 = vld [vmem:[#allocation5 + $0x3e0] ss:$8 sps:$4 sm:$0xff]   ;;  %v1412_v24 = vld [vmem:[#allocation5 + $0x1f4] ss:$8 sps:$4 sm:$0xff]  }
  0x69   :  { %999 = vmatpush1.bf16.msra.mxu0 %v1323_v25  ;;  %918 = vmatprep.subr.bf16.mxu1 %v1328_v26  ;;  %v1415_v25 = vld [vmem:[#allocation5 + $0x3f4] ss:$8 sps:$4 sm:$0xff]   ;;  %v1410_v26 = vld [vmem:[#allocation5 + $0x1f0] ss:$8 sps:$4 sm:$0xff]  }
  0x6a   :  { %1000 = vmatprep.subr.bf16.mxu0 %v1331_v27  ;;  %948 = vmatprep.mubr.bf16.mxu1 %v90_v28  ;;  %v1413_v27 = vld [vmem:[#allocation5 + $0x3f0] ss:$8 sps:$4 sm:$0xff]   ;;  %v89_v28 = vpack.c.bf16 %v1557_v14, %v1557_v14 }
  0x6b   :  { %1030 = vmatprep.mubr.bf16.mxu0 %v94_v29  ;;  %v93_v29 = vpack.c.bf16 %v1559_v15, %v1559_v15 }
  0x6c   :  { %919 = vmatpush1.bf16.msra.mxu1 %v1326_v30  ;;  %v227_v30 = vsub.s32 0, %v1550_v43 }
  0x6d   :  { %1001 = vmatpush1.bf16.msra.mxu0 %v1329_v31  ;;  %920 = vmatprep.subr.bf16.mxu1 %v1334_v32  ;;  %v223_v31 = vld [vmem:[%s1591_s2] sm:$0x3]  ;;  %v231_v32 = vsub.s32 1, %v1550_v43  ;;  %s1497_s2 = smov [#allocation7]  }
  0x6e   :  { %1002 = vmatprep.subr.bf16.mxu0 %v1337_v33  ;;  %v228_v33 = vrot.slane %v223_v31, %v227_v30  ;;  %s1066_s11 = sshll.u32 %s1497_s2, 4  ;;  %s1067_s11 = int_to_ptr.vmem [resolvable:$true] %s1066_s11 }
  0x6f   :  { %s1464_s12 = scalar_lea.vmem %s1067_s11, 64  ;;  %p1469_p3 = scmp.lt.s32.totalorder %s1067_s11, %s1067_s11 }
  0x70   :  { %921 = vmatpush1.bf16.msra.mxu1 %v1332_v34  ;;  %v232_v34 = vrot.slane %v223_v31, %v231_v32  ;;  %p1465_p2 = scmp.ne.s32.totalorder %s1067_s11, %s1464_s12  ;;  %p1470_p4 = scmp.lt.s32.totalorder %s1464_s12, %s1464_s12 }
  0x71   :  { %1003 = vmatpush1.bf16.msra.mxu0 %v1335_v35  ;;  %922 = vmatprep.subr.bf16.mxu1 %v1340_v36  ;;  %v1040_v35 = vand.u32 127, %v49_v38 }
  0x72   :  { %1004 = vmatprep.subr.bf16.mxu0 %v1343_v37  ;;  %p1471_p5 = por %p1470_p4, %p1469_p3 }
  0x73   :  { %vm1041_vm0 = vcmp.lt.s32.totalorder %v1040_v35, 8 }
  0x74   :  { %923 = vmatpush1.bf16.msra.mxu1 %v1338_v39  ;;  %p1472_p6 = pnand %p1471_p5, %p1465_p2 }
  0x75   :  { %1005 = vmatpush1.bf16.msra.mxu0 %v1341_v40  ;;  %924 = vmatprep.subr.bf16.mxu1 %v1346_v41 }
  0x76   :  { %1006 = vmatprep.subr.bf16.mxu0 %v1349_v42 }
  0x78   :  { %925 = vmatpush1.bf16.msra.mxu1 %v1344_v44 }
  0x79   :  { %1007 = vmatpush1.bf16.msra.mxu0 %v1347_v45  ;;  %926 = vmatprep.subr.bf16.mxu1 %v1352_v46 }
  0x7a   :  { %1008 = vmatprep.subr.bf16.mxu0 %v1355_v47 }
  0x7c   :  { %927 = vmatpush1.bf16.msra.mxu1 %v1350_v48 }
  0x7d   :  { %1009 = vmatpush1.bf16.msra.mxu0 %v1353_v49  ;;  %928 = vmatprep.subr.bf16.mxu1 %v1358_v50 }
  0x7e   :  { %1010 = vmatprep.subr.bf16.mxu0 %v1361_v51 }
  0x80   :  { %929 = vmatpush1.bf16.msra.mxu1 %v1356_v52 }
  0x81   :  { %1011 = vmatpush1.bf16.msra.mxu0 %v1359_v53  ;;  %930 = vmatprep.subr.bf16.mxu1 %v1364_v54 }
  0x82   :  { %1012 = vmatprep.subr.bf16.mxu0 %v1367_v55 }
  0x84   :  { %931 = vmatpush1.bf16.msra.mxu1 %v1362_v56 }
  0x85   :  { %1013 = vmatpush1.bf16.msra.mxu0 %v1365_v57  ;;  %932 = vmatprep.subr.bf16.mxu1 %v1370_v58 }
  0x86   :  { %1014 = vmatprep.subr.bf16.mxu0 %v1373_v59 }
  0x88   :  { %933 = vmatpush1.bf16.msra.mxu1 %v1368_v60 }
  0x89   :  { %1015 = vmatpush1.bf16.msra.mxu0 %v1371_v61  ;;  %934 = vmatprep.subr.bf16.mxu1 %v1376_v62 }
  0x8a   :  { %1016 = vmatprep.subr.bf16.mxu0 %v1379_v63 }
  0x8c   :  { %935 = vmatpush1.bf16.msra.mxu1 %v1374_v0 }
  0x8d   :  { %1017 = vmatpush1.bf16.msra.mxu0 %v1377_v1  ;;  %936 = vmatprep.subr.bf16.mxu1 %v1382_v2 }
  0x8e   :  { %1018 = vmatprep.subr.bf16.mxu0 %v1385_v3 }
  0x90   :  { %937 = vmatpush1.bf16.msra.mxu1 %v1380_v4 }
  0x91   :  { %1019 = vmatpush1.bf16.msra.mxu0 %v1383_v5  ;;  %938 = vmatprep.subr.bf16.mxu1 %v1388_v6 }
  0x92   :  { %1020 = vmatprep.subr.bf16.mxu0 %v1391_v7 }
  0x94   :  { %939 = vmatpush1.bf16.msra.mxu1 %v1386_v8 }
  0x95   :  { %1021 = vmatpush1.bf16.msra.mxu0 %v1389_v9  ;;  %940 = vmatprep.subr.bf16.mxu1 %v1394_v10 }
  0x96   :  { %1022 = vmatprep.subr.bf16.mxu0 %v1397_v11 }
  0x98   :  { %941 = vmatpush1.bf16.msra.mxu1 %v1392_v12 }
  0x99   :  { %1023 = vmatpush1.bf16.msra.mxu0 %v1395_v13  ;;  %942 = vmatprep.subr.bf16.mxu1 %v1400_v16 }
  0x9a   :  { %1024 = vmatprep.subr.bf16.mxu0 %v1403_v17 }
  0x9c   :  { %943 = vmatpush1.bf16.msra.mxu1 %v1398_v18 }
  0x9d   :  { %1025 = vmatpush1.bf16.msra.mxu0 %v1401_v19  ;;  %944 = vmatprep.subr.bf16.mxu1 %v1406_v20 }
  0x9e   :  { %1026 = vmatprep.subr.bf16.mxu0 %v1409_v21 }
  0xa0   :  { %945 = vmatpush1.bf16.msra.mxu1 %v1404_v22 }
  0xa1   :  { %1027 = vmatpush1.bf16.msra.mxu0 %v1407_v23  ;;  %946 = vmatprep.subr.bf16.mxu1 %v1412_v24 }
  0xa2   :  { %1028 = vmatprep.subr.bf16.mxu0 %v1415_v25 }
  0xa4   :  { %947 = vmatpush1.bf16.msra.mxu1 %v1410_v26 }
  0xa5   :  { %1029 = vmatpush1.bf16.msra.mxu0 %v1413_v27 }
  0xa7   :  { %949 = vmatmul.mubr.bf16.vlgmr.msra.gmra.mrb[0].mxu1 %v89_v28 }
  0xa8   :  { %1031 = vmatmul.mubr.bf16.vlgmr.msra.gmra.mrb[0].mxu0 %v93_v29 }
 0x17a   :  { %v950_v14 = vpop.f32.mrb[0].mxu1 }
 0x17b   :  { %v1032_v36 = vpop.f32.mrb[0].mxu0  ;;  %v1204_v37 = vadd.f32 %v950_v14, %v228_v33  ;;  %v952_v15 = vpop.f32.mrb[1].mxu1 }
 0x17c   :  { %v1034_v39 = vpop.f32.mrb[1].mxu0  ;;  %v1206_v40 = vadd.f32 %v952_v15, %v232_v34  ;;  %v954_v41 = vpop.f32.mrb[2].mxu1 }
 0x17d   :  { %v1036_v42 = vpop.f32.mrb[2].mxu0  ;;  %v1205_v44 = vadd.f32 %v1204_v37, %v1032_v36  ;;  %v955_v45 = vpop.f32.mrb[3].mxu1 }
 0x17e   :  { %v1037_v46 = vpop.f32.mrb[3].mxu0  ;;  %v1207_v47 = vadd.f32 %v1206_v40, %v1034_v39 }
 0x17f   :  { %v1044_v48 = vsel %vm1041_vm0, %v1205_v44, -inf }
 0x180   :  { %1059 = vst [vmem:[#allocation7 + $0x2] sm:$0x3] %v1207_v47  ;;  %v1046_v43 = vsel %vm1045_vm1, %v1044_v48, -inf }
 0x181   :  { %1047 = vmax.xlane.f32.xlu0 %v1046_v43 }
 0x20e   :  { %v1048_v49 = vpop.xlane.xlu0 %1047 }
 0x20f   :  { %v1049_v38 = vsub.f32 %v1044_v48, %v1048_v49 }
 0x211   :  { %v1050_v50 = vmul.f32 1.442695, %v1049_v38 }
 0x213   :  { %1416 = vpow2.f32 %v1050_v50 }
 0x21d   :  { %v1417_v51 = vpop.eup %1416 }
 0x21e   :  { %v1052_v52 = vsel %vm1041_vm0, %v1417_v51, 0.0 }
 0x21f   :  { %v1053_v53 = vsel %vm1045_vm1, %v1052_v52, 0.0 }
 0x220   :  { %1054 = vadd.xlane.f32.xlu0 %v1053_v53 }
 0x2ad   :  { %v1055_v54 = vpop.xlane.xlu0 %1054 }
 0x2ae   :  { %1418 = vrcp.f32 %v1055_v54 }
 0x2b8   :  { %v1419_v55 = vpop.eup %1418 }
 0x2b9   :  { %v1057_v56 = vmul.f32 %v1419_v55, %v1052_v52 }
 0x2bb   :  { %1058 = vst [vmem:[#allocation7] sm:$0x3] %v1057_v56 }
 0x2bc   :  { %1475 = shalt.err (!%p1472_p6)
}
 0x2bd   :  { %s1476_s15 = scalar_lea.hbm %s1592_s3, 64 }
 0x2be   :  { %p1477_p7 = scmp.ne.s32.totalorder %s1592_s3, %s1476_s15  ;;  %p1480_p8 = scmp.lt.u32.totalorder %s1476_s15, %s1592_s3 }
 0x2c0   :  { %p1482_p9 = pnand %p1480_p8, %p1477_p7 }
 0x2c2   :  { %1485 = shalt.err (!%p1482_p9)
}
 0x2c3   :  { %1069 = dma.vmem_to_hbm [thread:$0]  %s1067_s11, 64, %s1592_s3, [#allocation4]  }
 0x2c4   :  { %1490 = dma.done.wait [#allocation4], 64  }
 0x2c5   :  { %1491 = vsyncadd [#allocation4], 4294967232 }
 0x2c6   :  { %1073 = vsyncpa [#allocation3], 1 }
 0x2c7   :  { %1074 = vsyncpa [#allocation6], 1 }
 0x2c8   :  { %1075 = vsyncpa [#allocation4], 1 }

</bundles_post_ra>
